<compile_context>
chip_gen: v7x
topology: tpu7x:2x2x1
jax: 0.10.0
libtpu: 0.0.40
codegen_flags: <defaults>
</compile_context>

<pallas_src>
import functools

import jax
import jax.numpy as jnp
from jax.experimental import pallas as pl
from jax.experimental.pallas import tpu as pltpu


def _copy_kernel(x_ref, o_ref, *, scale):
    # Fast path: one replica per grid step -> pure scaled copy.
    o_ref[...] = (x_ref[...].astype(jnp.float32) * scale).astype(o_ref.dtype)


def _replicate_kernel(x_ref, o_ref, *, k, h, w, scale):
    # Fallback path: write each replica through a static-slice ref view
    # (zero-cost views; no concatenate temporary in VMEM).
    xt = (x_ref[...].astype(jnp.float32) * scale).astype(o_ref.dtype)
    for r in range(k):
        for s in range(k):
            o_ref[:, r * h:(r + 1) * h, s * w:(s + 1) * w] = xt


def _vmem_budget_bytes():
    """Generation-aware scoped-VMEM limit and per-call block budget."""
    try:
        cap = int(pltpu.get_tpu_info().vmem_capacity_bytes)
    except Exception:
        cap = 64 * 1024 * 1024  # conservative (v7x physical VMEM)
    # Scoped limit: 3/4 of physical, capped at 100 MiB (96 MiB on v5e/v6e,
    # 48 MiB on v7x). Half of that for the double-buffered (in+out) blocks.
    vmem_limit = int(min(cap * 3 // 4, 100 * 1024 * 1024))
    block_budget = vmem_limit // 2
    return block_budget, vmem_limit


def unpool(x, kernel_size: int, *, bc_tile=None):
    """Pallas implementation of UnPool.forward for 4-D NCHW inputs."""
    # TODO(synk): the PyTorch module handles an arbitrary number of spatial
    # dims; this kernel implements the common 2-spatial-dim (NCHW) case.
    B, C, H, W = x.shape
    k = int(kernel_size)
    scale = 1.0 / (float(k) ** 2)

    in_dtype = x.dtype
    # PyTorch's `/` promotes integer inputs to floating point.
    out_dtype = in_dtype if jnp.issubdtype(in_dtype, jnp.floating) else jnp.float32
    in_item = jnp.dtype(in_dtype).itemsize
    out_item = jnp.dtype(out_dtype).itemsize

    BC = B * C
    kH, kW = k * H, k * W
    x3 = x.reshape(BC, H, W)  # contiguous -> free reshape, no dtype cast here

    block_budget, vmem_limit = _vmem_budget_bytes()

    # Grid-based replication is only BlockSpec-legal when the (H, W) output
    # block is (8, 128)-divisible; otherwise fall back to full-extent blocks.
    fast = (H % 8 == 0) and (W % 128 == 0)

    if fast:
        per_bc = 2 * H * W * (in_item + out_item)          # 2x (in + out) blocks
    else:
        per_bc = 2 * (H * W * in_item + kH * kW * out_item)

    if bc_tile is None:
        bc_tile = max(1, min(BC, block_budget // per_bc))
    bc_tile = int(bc_tile)
    grid_bc = pl.cdiv(BC, bc_tile)  # ragged last block handled by Pallas

    cost = pl.CostEstimate(
        flops=BC * kH * kW,  # one multiply per output element
        transcendentals=0,
        bytes_accessed=BC * H * W * in_item + BC * kH * kW * out_item,
    )

    if fast:
        out3 = pl.pallas_call(
            functools.partial(_copy_kernel, scale=scale),
            out_shape=jax.ShapeDtypeStruct((BC, kH, kW), out_dtype),
            grid=(grid_bc, k, k),
            in_specs=[
                # Block index constant across (r, s) -> fetched once per BC tile.
                pl.BlockSpec((bc_tile, H, W), lambda i, r, s: (i, 0, 0)),
            ],
            out_specs=pl.BlockSpec((bc_tile, H, W), lambda i, r, s: (i, r, s)),
            compiler_params=pltpu.CompilerParams(
                dimension_semantics=("parallel", "arbitrary", "arbitrary"),
                vmem_limit_bytes=vmem_limit,
            ),
            cost_estimate=cost,
        )(x3)
    else:
        out3 = pl.pallas_call(
            functools.partial(_replicate_kernel, k=k, h=H, w=W, scale=scale),
            out_shape=jax.ShapeDtypeStruct((BC, kH, kW), out_dtype),
            grid=(grid_bc,),
            in_specs=[
                # Last two block dims equal the full array dims -> always legal.
                pl.BlockSpec((bc_tile, H, W), lambda i: (i, 0, 0)),
            ],
            out_specs=pl.BlockSpec((bc_tile, kH, kW), lambda i: (i, 0, 0)),
            compiler_params=pltpu.CompilerParams(
                dimension_semantics=("parallel",),
                vmem_limit_bytes=vmem_limit,
            ),
            cost_estimate=cost,
        )(x3)

    return out3.reshape(B, C, kH, kW)


def _reference_unpool(x, kernel_size: int):
    k = kernel_size
    xf = x if jnp.issubdtype(x.dtype, jnp.floating) else x.astype(jnp.float32)
    # cat([x/k]*k, dim=2) then cat([./k]*k, dim=3)  ==  tile whole block, /k^2
    return jnp.tile(xf, (1, 1, k, k)) / float(k * k)


if __name__ == "__main__":
    key = jax.random.PRNGKey(0)

    # Case 1: module-consistent small shape, k = 2 (fallback path, W < 128).
    x1 = jax.random.normal(key, (2, 4, 16, 16), dtype=jnp.float32)
    out1 = jax.block_until_ready(unpool(x1, 2))
    ref1 = _reference_unpool(x1, 2)
    assert out1.shape == (2, 4, 32, 32), out1.shape
    assert jnp.allclose(out1, ref1, atol=1e-6, rtol=1e-6), "mismatch (k=2, fallback)"

    # Case 2: aligned shape -> grid-replication fast path; bc_tile=3 forces a
    # ragged cdiv grid on the leading dim (BC=4).
    x2 = jax.random.normal(jax.random.PRNGKey(1), (2, 2, 8, 128), dtype=jnp.float32)
    out2 = jax.block_until_ready(unpool(x2, 2, bc_tile=3))
    ref2 = _reference_unpool(x2, 2)
    assert out2.shape == (2, 2, 16, 256), out2.shape
    assert jnp.allclose(out2, ref2, atol=1e-6, rtol=1e-6), "mismatch (k=2, fast path)"

    # Case 3: odd replication factor, ragged BC tiling on the fallback path.
    x3 = jax.random.normal(jax.random.PRNGKey(2), (2, 3, 8, 8), dtype=jnp.float32)
    out3 = jax.block_until_ready(unpool(x3, 3, bc_tile=4))
    ref3 = _reference_unpool(x3, 3)
    assert out3.shape == (2, 3, 24, 24), out3.shape
    assert jnp.allclose(out3, ref3, atol=1e-6, rtol=1e-6), "mismatch (k=3, ragged)"

    # Case 4: integer input -> float32 output, cast happens inside the kernel.
    x4 = jax.random.randint(jax.random.PRNGKey(3), (2, 2, 4, 8), 0, 10, dtype=jnp.int32)
    out4 = jax.block_until_ready(unpool(x4, 2))
    ref4 = _reference_unpool(x4, 2)
    assert out4.dtype == jnp.float32, out4.dtype
    assert out4.shape == (2, 2, 8, 16), out4.shape
    assert jnp.allclose(out4, ref4, atol=1e-6, rtol=1e-6), "mismatch (int input)"

    print("KERNEL_OK")
</pallas_src>

<mosaic_0001>
module attributes {stable_mosaic.version = 11 : i64} {
  func.func @_replicate_kernel(%arg0: i32, %arg1: memref<8x16x16xf32, #tpu.memory_space<vmem>>, %arg2: memref<8x32x32xf32, #tpu.memory_space<vmem>>) attributes {dimension_semantics = [#tpu.dimension_semantics<parallel>], iteration_bounds = array<i64: 1>, scalar_prefetch = 0 : i64, scratch_operands = 0 : i64, tpu.core_type = #tpu.core_type<tc>, window_params = [{transform_indices = @transform_0, window_bounds = array<i64: 8, 16, 16>}, {transform_indices = @transform_1, window_bounds = array<i64: 8, 32, 32>}]} {
    %c0 = arith.constant 0 : index
    %c0_0 = arith.constant 0 : index
    %c0_1 = arith.constant 0 : index
    %0 = vector.load %arg1[%c0, %c0_0, %c0_1] : memref<8x16x16xf32, #tpu.memory_space<vmem>>, vector<8x16x16xf32>
    %cst = arith.constant 2.500000e-01 : f32
    %1 = vector.broadcast %cst : f32 to vector<8x16x16xf32>
    %2 = arith.mulf %0, %1 : vector<8x16x16xf32>
    %c0_2 = arith.constant 0 : index
    %c0_3 = arith.constant 0 : index
    %c0_4 = arith.constant 0 : index
    %3 = vector.load %arg2[%c0_2, %c0_3, %c0_4] : memref<8x32x32xf32, #tpu.memory_space<vmem>>, vector<8x16x16xf32>
    tpu.vector_store %arg2[%c0_2, %c0_3, %c0_4], %2 {strides = array<i32>} : memref<8x32x32xf32, #tpu.memory_space<vmem>>, vector<8x16x16xf32>,
    %c0_5 = arith.constant 0 : index
    %c0_6 = arith.constant 0 : index
    %c16 = arith.constant 16 : index
    %4 = vector.load %arg2[%c0_5, %c0_6, %c16] : memref<8x32x32xf32, #tpu.memory_space<vmem>>, vector<8x16x16xf32>
    tpu.vector_store %arg2[%c0_5, %c0_6, %c16], %2 {strides = array<i32>} : memref<8x32x32xf32, #tpu.memory_space<vmem>>, vector<8x16x16xf32>,
    %c0_7 = arith.constant 0 : index
    %c16_8 = arith.constant 16 : index
    %c0_9 = arith.constant 0 : index
    %5 = vector.load %arg2[%c0_7, %c16_8, %c0_9] : memref<8x32x32xf32, #tpu.memory_space<vmem>>, vector<8x16x16xf32>
    tpu.vector_store %arg2[%c0_7, %c16_8, %c0_9], %2 {strides = array<i32>} : memref<8x32x32xf32, #tpu.memory_space<vmem>>, vector<8x16x16xf32>,
    %c0_10 = arith.constant 0 : index
    %c16_11 = arith.constant 16 : index
    %c16_12 = arith.constant 16 : index
    %6 = vector.load %arg2[%c0_10, %c16_11, %c16_12] : memref<8x32x32xf32, #tpu.memory_space<vmem>>, vector<8x16x16xf32>
    tpu.vector_store %arg2[%c0_10, %c16_11, %c16_12], %2 {strides = array<i32>} : memref<8x32x32xf32, #tpu.memory_space<vmem>>, vector<8x16x16xf32>,
    return
  }
  func.func @transform_0(%arg0: i32) -> (i32, i32, i32) {
    %c0_i32 = arith.constant 0 : i32
    %c0_i32_0 = arith.constant 0 : i32
    %c0_i32_1 = arith.constant 0 : i32
    return %arg0, %c0_i32, %c0_i32_0 : i32, i32, i32
  }
  func.func @transform_1(%arg0: i32) -> (i32, i32, i32) {
    %c0_i32 = arith.constant 0 : i32
    %c0_i32_0 = arith.constant 0 : i32
    %c0_i32_1 = arith.constant 0 : i32
    return %arg0, %c0_i32, %c0_i32_0 : i32, i32, i32
  }
}

</mosaic_0001>

<bundles_post_ra>
// kernel: tpu_custom_call.1
= control target key start
LH: loop header
LB: loop body
LE: loop exit
PB: predicated region body
PF: predicated region fallthrough
CT: control target
= control target key end

     0   :  { %6 = vsyncpa [#allocation3], 0  ;;  %s380_s0 = inlined_call_operand.hbm [shape: f32[8,16,16], index: 0, kind: input, shape index: {}]   ;;  %s381_s1 = inlined_call_operand.hbm [shape: f32[8,32,32], index: 1, kind: output, shape index: {}]  }
   0x1   :  { %7 = vsyncpa [#allocation4], 0  ;;  %s255_s6 = smov [#allocation2]   ;;  %s207_s10 = scalar_lea.hbm %s380_s0, 2048 }
   0x2   :  { %s13_s7 = sshll.u32 %s255_s6, 4  ;;  %p208_p0 = scmp.ne.s32.totalorder %s380_s0, %s207_s10  ;;  %s14_s7 = int_to_ptr.vmem [resolvable:$true] %s13_s7 }
   0x3   :  { %p211_p1 = scmp.lt.u32.totalorder %s207_s10, %s380_s0 }
   0x5   :  { %p213_p2 = pnand %p211_p1, %p208_p0 }
   0x7   :  { %216 = shalt.err (!%p213_p2)
}
   0x8   :  { %s217_s15 = scalar_lea.vmem %s14_s7, 2048  ;;  %p222_p4 = scmp.lt.s32.totalorder %s14_s7, %s14_s7 }
   0x9   :  { %p218_p3 = scmp.ne.s32.totalorder %s14_s7, %s217_s15  ;;  %p223_p5 = scmp.lt.s32.totalorder %s217_s15, %s217_s15 }
   0xb   :  { %p224_p6 = por %p223_p5, %p222_p4 }
   0xd   :  { %p225_p7 = pnand %p224_p6, %p218_p3 }
   0xf   :  { %228 = shalt.err (!%p225_p7)
}
  0x10   :  { %s256_s16 = smov 128   ;;  %s257_s17 = smov 8  }
  0x11   :  { %19 = dma.hbm_to_vmem [thread:$0]  %s380_s0, 2048, %s14_s7, [#allocation3], %s256_s16, %s256_s16, %s257_s17  }
  0x12   :  { %251 = dma.done.wait [#allocation3], 2048  }
  0x13   :  { %252 = vsyncadd [#allocation3], 4294965248  ;;  %v25_v0 = vld [vmem:[#allocation2 + $0x10] sm:$0xff]  ;;  %v23_v1 = vld [vmem:[#allocation2] sm:$0xff]  ;;  %vm55_vm0 = vcmask 130048   ;;  %s258_s20 = smov 16  }
  0x14   :  { %v26_v2 = vld [vmem:[#allocation2 + $0x18] sm:$0xff]  ;;  %v41_v3 = vmul.f32 0.25, %v25_v0  ;;  %v39_v4 = vmul.f32 0.25, %v23_v1  ;;  %v24_v6 = vld [vmem:[#allocation2 + $0x8] sm:$0xff]  ;;  %v27_v8 = vld [vmem:[#allocation2 + $0x20] sm:$0xff]  ;;  %vm136_vm1 = vcmask 261248  }
  0x15   :  { %v42_v5 = vmul.f32 0.25, %v26_v2  ;;  %v28_v7 = vld [vmem:[#allocation2 + $0x28] sm:$0xff]  ;;  %v40_v9 = vmul.f32 0.25, %v24_v6  ;;  %v43_v11 = vmul.f32 0.25, %v27_v8  ;;  %v30_v12 = vld [vmem:[#allocation2 + $0x38] sm:$0xff]  ;;  %v29_v13 = vld [vmem:[#allocation2 + $0x30] sm:$0xff] }
  0x16   :  { %v44_v10 = vmul.f32 0.25, %v28_v7  ;;  %v32_v14 = vld [vmem:[#allocation2 + $0x48] sm:$0xff]  ;;  %92 = vrot.lane.b32.xlu1 %v41_v3, %s258_s20  ;;  %88 = vrot.lane.b32.xlu0 %v39_v4, %s258_s20  ;;  %v46_v15 = vmul.f32 0.25, %v30_v12  ;;  %v45_v16 = vmul.f32 0.25, %v29_v13  ;;  %v31_v18 = vld [vmem:[#allocation2 + $0x40] sm:$0xff]  ;;  %v34_v19 = vld [vmem:[#allocation2 + $0x58] sm:$0xff] }
  0x17   :  { %v48_v17 = vmul.f32 0.25, %v32_v14  ;;  %v33_v20 = vld [vmem:[#allocation2 + $0x50] sm:$0xff]  ;;  %58 = vst.msk [vmem:[#allocation5 + $0x20] sm:$0xff] %vm55_vm0, %v41_v3  ;;  %155 = vst.msk [vmem:[#allocation5 + $0x30] sm:$0xff] %vm55_vm0, %v41_v3  ;;  %v47_v21 = vmul.f32 0.25, %v31_v18  ;;  %v50_v22 = vmul.f32 0.25, %v34_v19 }
  0x18   :  { %56 = vst.msk [vmem:[#allocation5] sm:$0xff] %vm55_vm0, %v39_v4  ;;  %59 = vst.msk [vmem:[#allocation5 + $0x28] sm:$0xff] %vm55_vm0, %v42_v5  ;;  %v49_v23 = vmul.f32 0.25, %v33_v20  ;;  %v36_v24 = vld [vmem:[#allocation2 + $0x68] sm:$0xff]  ;;  %v35_v25 = vld [vmem:[#allocation2 + $0x60] sm:$0xff]  ;;  %s259_s0 = smov [#allocation5]  }
  0x19   :  { %153 = vst.msk [vmem:[#allocation5 + $0x10] sm:$0xff] %vm55_vm0, %v39_v4  ;;  %156 = vst.msk [vmem:[#allocation5 + $0x38] sm:$0xff] %vm55_vm0, %v42_v5  ;;  %v38_v26 = vld [vmem:[#allocation2 + $0x78] sm:$0xff]  ;;  %v52_v27 = vmul.f32 0.25, %v36_v24  ;;  %v51_v28 = vmul.f32 0.25, %v35_v25  ;;  %v37_v30 = vld [vmem:[#allocation2 + $0x70] sm:$0xff] }
  0x1a   :  { %57 = vst.msk [vmem:[#allocation5 + $0x8] sm:$0xff] %vm55_vm0, %v40_v9  ;;  %60 = vst.msk [vmem:[#allocation5 + $0x40] sm:$0xff] %vm55_vm0, %v43_v11  ;;  %v54_v29 = vmul.f32 0.25, %v38_v26  ;;  %v53_v31 = vmul.f32 0.25, %v37_v30  ;;  %94 = vrot.lane.b32.xlu1 %v42_v5, %s258_s20  ;;  %90 = vrot.lane.b32.xlu0 %v40_v9, %s258_s20  ;;  %s190_s21 = sshll.u32 %s259_s0, 4  ;;  %s191_s21 = int_to_ptr.vmem [resolvable:$true] %s190_s21 }
  0x1b   :  { %61 = vst.msk [vmem:[#allocation5 + $0x48] sm:$0xff] %vm55_vm0, %v44_v10  ;;  %154 = vst.msk [vmem:[#allocation5 + $0x18] sm:$0xff] %vm55_vm0, %v40_v9  ;;  %s229_s22 = scalar_lea.vmem %s191_s21, 4096  ;;  %p234_p9 = scmp.lt.s32.totalorder %s191_s21, %s191_s21 }
  0x1c   :  { %157 = vst.msk [vmem:[#allocation5 + $0x50] sm:$0xff] %vm55_vm0, %v43_v11  ;;  %158 = vst.msk [vmem:[#allocation5 + $0x58] sm:$0xff] %vm55_vm0, %v44_v10  ;;  %p230_p8 = scmp.ne.s32.totalorder %s191_s21, %s229_s22  ;;  %p235_p10 = scmp.lt.s32.totalorder %s229_s22, %s229_s22 }
  0x1d   :  { %62 = vst.msk [vmem:[#allocation5 + $0x60] sm:$0xff] %vm55_vm0, %v45_v16  ;;  %63 = vst.msk [vmem:[#allocation5 + $0x68] sm:$0xff] %vm55_vm0, %v46_v15 }
  0x1e   :  { %65 = vst.msk [vmem:[#allocation5 + $0x88] sm:$0xff] %vm55_vm0, %v48_v17  ;;  %159 = vst.msk [vmem:[#allocation5 + $0x70] sm:$0xff] %vm55_vm0, %v45_v16  ;;  %98 = vrot.lane.b32.xlu1 %v44_v10, %s258_s20  ;;  %96 = vrot.lane.b32.xlu0 %v43_v11, %s258_s20  ;;  %p236_p11 = por %p235_p10, %p234_p9 }
  0x1f   :  { %160 = vst.msk [vmem:[#allocation5 + $0x78] sm:$0xff] %vm55_vm0, %v46_v15  ;;  %162 = vst.msk [vmem:[#allocation5 + $0x98] sm:$0xff] %vm55_vm0, %v48_v17 }
  0x20   :  { %64 = vst.msk [vmem:[#allocation5 + $0x80] sm:$0xff] %vm55_vm0, %v47_v21  ;;  %66 = vst.msk [vmem:[#allocation5 + $0xa0] sm:$0xff] %vm55_vm0, %v49_v23  ;;  %p237_p12 = pnand %p236_p11, %p230_p8 }
  0x21   :  { %67 = vst.msk [vmem:[#allocation5 + $0xa8] sm:$0xff] %vm55_vm0, %v50_v22  ;;  %161 = vst.msk [vmem:[#allocation5 + $0x90] sm:$0xff] %vm55_vm0, %v47_v21 }
  0x22   :  { %163 = vst.msk [vmem:[#allocation5 + $0xb0] sm:$0xff] %vm55_vm0, %v49_v23  ;;  %164 = vst.msk [vmem:[#allocation5 + $0xb8] sm:$0xff] %vm55_vm0, %v50_v22  ;;  %102 = vrot.lane.b32.xlu1 %v46_v15, %s258_s20  ;;  %100 = vrot.lane.b32.xlu0 %v45_v16, %s258_s20 }
  0x23   :  { %68 = vst.msk [vmem:[#allocation5 + $0xc0] sm:$0xff] %vm55_vm0, %v51_v28  ;;  %69 = vst.msk [vmem:[#allocation5 + $0xc8] sm:$0xff] %vm55_vm0, %v52_v27 }
  0x24   :  { %71 = vst.msk [vmem:[#allocation5 + $0xe8] sm:$0xff] %vm55_vm0, %v54_v29  ;;  %165 = vst.msk [vmem:[#allocation5 + $0xd0] sm:$0xff] %vm55_vm0, %v51_v28 }
  0x25   :  { %166 = vst.msk [vmem:[#allocation5 + $0xd8] sm:$0xff] %vm55_vm0, %v52_v27  ;;  %168 = vst.msk [vmem:[#allocation5 + $0xf8] sm:$0xff] %vm55_vm0, %v54_v29 }
  0x26   :  { %70 = vst.msk [vmem:[#allocation5 + $0xe0] sm:$0xff] %vm55_vm0, %v53_v31  ;;  %167 = vst.msk [vmem:[#allocation5 + $0xf0] sm:$0xff] %vm55_vm0, %v53_v31  ;;  %106 = vrot.lane.b32.xlu1 %v48_v17, %s258_s20  ;;  %104 = vrot.lane.b32.xlu0 %v47_v21, %s258_s20 }
  0x2a   :  { %110 = vrot.lane.b32.xlu1 %v50_v22, %s258_s20  ;;  %108 = vrot.lane.b32.xlu0 %v49_v23, %s258_s20 }
  0x2e   :  { %114 = vrot.lane.b32.xlu1 %v52_v27, %s258_s20  ;;  %112 = vrot.lane.b32.xlu0 %v51_v28, %s258_s20 }
  0x32   :  { %118 = vrot.lane.b32.xlu1 %v54_v29, %s258_s20  ;;  %116 = vrot.lane.b32.xlu0 %v53_v31, %s258_s20 }
  0x88   :  { %v93_v32 = vpop.permute.xlu1 %92  ;;  %v89_v33 = vpop.permute.xlu0 %88 }
  0x89   :  { %139 = vst.msk [vmem:[#allocation5 + $0x20] sm:$0xff] %vm136_vm1, %v93_v32  ;;  %171 = vst.msk [vmem:[#allocation5 + $0x30] sm:$0xff] %vm136_vm1, %v93_v32 }
  0x8a   :  { %137 = vst.msk [vmem:[#allocation5] sm:$0xff] %vm136_vm1, %v89_v33  ;;  %169 = vst.msk [vmem:[#allocation5 + $0x10] sm:$0xff] %vm136_vm1, %v89_v33 }
  0x8c   :  { %v95_v34 = vpop.permute.xlu1 %94  ;;  %v91_v35 = vpop.permute.xlu0 %90 }
  0x8d   :  { %140 = vst.msk [vmem:[#allocation5 + $0x28] sm:$0xff] %vm136_vm1, %v95_v34  ;;  %172 = vst.msk [vmem:[#allocation5 + $0x38] sm:$0xff] %vm136_vm1, %v95_v34 }
  0x8e   :  { %138 = vst.msk [vmem:[#allocation5 + $0x8] sm:$0xff] %vm136_vm1, %v91_v35  ;;  %170 = vst.msk [vmem:[#allocation5 + $0x18] sm:$0xff] %vm136_vm1, %v91_v35 }
  0x90   :  { %v99_v36 = vpop.permute.xlu1 %98  ;;  %v97_v37 = vpop.permute.xlu0 %96 }
  0x91   :  { %142 = vst.msk [vmem:[#allocation5 + $0x48] sm:$0xff] %vm136_vm1, %v99_v36  ;;  %174 = vst.msk [vmem:[#allocation5 + $0x58] sm:$0xff] %vm136_vm1, %v99_v36 }
  0x92   :  { %141 = vst.msk [vmem:[#allocation5 + $0x40] sm:$0xff] %vm136_vm1, %v97_v37  ;;  %173 = vst.msk [vmem:[#allocation5 + $0x50] sm:$0xff] %vm136_vm1, %v97_v37 }
  0x94   :  { %v103_v38 = vpop.permute.xlu1 %102  ;;  %v101_v39 = vpop.permute.xlu0 %100 }
  0x95   :  { %144 = vst.msk [vmem:[#allocation5 + $0x68] sm:$0xff] %vm136_vm1, %v103_v38  ;;  %176 = vst.msk [vmem:[#allocation5 + $0x78] sm:$0xff] %vm136_vm1, %v103_v38 }
  0x96   :  { %143 = vst.msk [vmem:[#allocation5 + $0x60] sm:$0xff] %vm136_vm1, %v101_v39  ;;  %175 = vst.msk [vmem:[#allocation5 + $0x70] sm:$0xff] %vm136_vm1, %v101_v39 }
  0x98   :  { %v107_v40 = vpop.permute.xlu1 %106  ;;  %v105_v41 = vpop.permute.xlu0 %104 }
  0x99   :  { %146 = vst.msk [vmem:[#allocation5 + $0x88] sm:$0xff] %vm136_vm1, %v107_v40  ;;  %178 = vst.msk [vmem:[#allocation5 + $0x98] sm:$0xff] %vm136_vm1, %v107_v40 }
  0x9a   :  { %145 = vst.msk [vmem:[#allocation5 + $0x80] sm:$0xff] %vm136_vm1, %v105_v41  ;;  %177 = vst.msk [vmem:[#allocation5 + $0x90] sm:$0xff] %vm136_vm1, %v105_v41 }
  0x9c   :  { %v111_v42 = vpop.permute.xlu1 %110  ;;  %v109_v43 = vpop.permute.xlu0 %108 }
  0x9d   :  { %148 = vst.msk [vmem:[#allocation5 + $0xa8] sm:$0xff] %vm136_vm1, %v111_v42  ;;  %180 = vst.msk [vmem:[#allocation5 + $0xb8] sm:$0xff] %vm136_vm1, %v111_v42 }
  0x9e   :  { %147 = vst.msk [vmem:[#allocation5 + $0xa0] sm:$0xff] %vm136_vm1, %v109_v43  ;;  %179 = vst.msk [vmem:[#allocation5 + $0xb0] sm:$0xff] %vm136_vm1, %v109_v43 }
  0xa0   :  { %v115_v44 = vpop.permute.xlu1 %114  ;;  %v113_v45 = vpop.permute.xlu0 %112 }
  0xa1   :  { %150 = vst.msk [vmem:[#allocation5 + $0xc8] sm:$0xff] %vm136_vm1, %v115_v44  ;;  %182 = vst.msk [vmem:[#allocation5 + $0xd8] sm:$0xff] %vm136_vm1, %v115_v44 }
  0xa2   :  { %149 = vst.msk [vmem:[#allocation5 + $0xc0] sm:$0xff] %vm136_vm1, %v113_v45  ;;  %181 = vst.msk [vmem:[#allocation5 + $0xd0] sm:$0xff] %vm136_vm1, %v113_v45 }
  0xa4   :  { %v119_v46 = vpop.permute.xlu1 %118  ;;  %v117_v47 = vpop.permute.xlu0 %116 }
  0xa5   :  { %152 = vst.msk [vmem:[#allocation5 + $0xe8] sm:$0xff] %vm136_vm1, %v119_v46  ;;  %184 = vst.msk [vmem:[#allocation5 + $0xf8] sm:$0xff] %vm136_vm1, %v119_v46 }
  0xa6   :  { %151 = vst.msk [vmem:[#allocation5 + $0xe0] sm:$0xff] %vm136_vm1, %v117_v47  ;;  %183 = vst.msk [vmem:[#allocation5 + $0xf0] sm:$0xff] %vm136_vm1, %v117_v47 }
  0xa7   :  { %240 = shalt.err (!%p237_p12)
}
  0xa8   :  { %s241_s25 = scalar_lea.hbm %s381_s1, 4096 }
  0xa9   :  { %p242_p13 = scmp.ne.s32.totalorder %s381_s1, %s241_s25  ;;  %p245_p0 = scmp.lt.u32.totalorder %s241_s25, %s381_s1 }
  0xab   :  { %p247_p1 = pnand %p245_p0, %p242_p13 }
  0xad   :  { %250 = shalt.err (!%p247_p1)
}
  0xae   :  { %196 = dma.vmem_to_hbm [thread:$0]  %s191_s21, 4096, %s381_s1, [#allocation4], %s256_s16, %s256_s16, %s257_s17  }
  0xaf   :  { %253 = dma.done.wait [#allocation4], 4096  }
  0xb0   :  { %254 = vsyncadd [#allocation4], 4294963200 }
  0xb1   :  { %200 = vsyncpa [#allocation3], 1 }
  0xb2   :  { %201 = vsyncpa [#allocation4], 1 }

</bundles_post_ra>
